<compile_context>
chip_gen: v7x
topology: tpu7x:2x2x1
jax: 0.10.0
libtpu: 0.0.40
codegen_flags: <defaults>
</compile_context>

<pallas_src>
import jax
import jax.numpy as jnp
from jax.experimental import pallas as pl


def _round_up(n: int, m: int) -> int:
    return ((n + m - 1) // m) * m


# ----------------------------------------------------------------------------
# Fused kernel: image MLP + text MLP (pos & neg stacked), single invocation.
#   img branch : relu(img @ IW1 + ib1) @ IW2 + ib2          -> rows [0, Bp)
#   text branch: relu(txt @ TW1 + tb1) @ TW2 + tb2          -> rows [Bp, 3Bp)
#     where txt = [pos ; neg] so the text weights are loaded once.
# Weights / activations arrive in bf16; accumulation and bias/ReLU are f32.
# ----------------------------------------------------------------------------
def _triplet_kernel(img_ref, txt_ref,
                    iw1_ref, ib1_ref, iw2_ref, ib2_ref,
                    tw1_ref, tb1_ref, tw2_ref, tb2_ref,
                    out_ref):
    Bp = img_ref.shape[0]  # static

    # ---- image branch --------------------------------------------------- MXU
    h = jnp.dot(img_ref[...], iw1_ref[...],
                preferred_element_type=jnp.float32)           # (Bp, Hi) f32 acc
    h = jnp.maximum(h + ib1_ref[...], 0.0)                    # bias+ReLU (VPU)
    y = jnp.dot(h.astype(iw2_ref.dtype), iw2_ref[...],
                preferred_element_type=jnp.float32)           # (Bp, D)
    out_ref[:Bp, :] = (y + ib2_ref[...]).astype(out_ref.dtype)

    # ---- text branch: pos and neg rows share one weight load ------------ MXU
    h = jnp.dot(txt_ref[...], tw1_ref[...],
                preferred_element_type=jnp.float32)           # (2Bp, Ht)
    h = jnp.maximum(h + tb1_ref[...], 0.0)
    y = jnp.dot(h.astype(tw2_ref.dtype), tw2_ref[...],
                preferred_element_type=jnp.float32)           # (2Bp, D)
    out_ref[Bp:, :] = (y + tb2_ref[...]).astype(out_ref.dtype)


def triplet_forward(img_feat, pos_text, neg_text, image_params, text_params):
    """Single pallas_call producing (img_emb, pos_emb, neg_emb).

    img_feat: (B, F_img) f32     pos_text/neg_text: (B, T_feat) f32
    params:   dicts with w1 (F,H), b1 (1,H), w2 (H,D), b2 (1,D) in f32
    returns three (B, D) f32 arrays.
    """
    B = img_feat.shape[0]
    ip, tp = image_params, text_params
    F_img = img_feat.shape[1]
    T = pos_text.shape[1]
    Hi = ip["w1"].shape[1]
    Ht = tp["w1"].shape[1]
    D = ip["w2"].shape[1]

    # Pad rows to the f32 sublane multiple (8) -> aligned, unmasked stores.
    Bp = _round_up(B, 8)

    def pad_rows(x, rows):
        return x if x.shape[0] == rows else jnp.pad(x, ((0, rows - x.shape[0]), (0, 0)))

    bf16 = lambda a: a.astype(jnp.bfloat16)

    img_x = bf16(pad_rows(img_feat, Bp))                              # (Bp, F_img)
    txt_x = bf16(jnp.concatenate(
        [pad_rows(pos_text, Bp), pad_rows(neg_text, Bp)], axis=0))    # (2Bp, T)

    # grid=() single invocation: every operand is one full-array block in VMEM.
    full = lambda shape: pl.BlockSpec(shape, lambda: tuple(0 for _ in shape))

    out = pl.pallas_call(
        _triplet_kernel,
        out_shape=jax.ShapeDtypeStruct((3 * Bp, D), jnp.float32),
        grid=(),
        in_specs=[
            full((Bp, F_img)), full((2 * Bp, T)),
            full((F_img, Hi)), full((1, Hi)), full((Hi, D)), full((1, D)),
            full((T, Ht)),     full((1, Ht)), full((Ht, D)), full((1, D)),
        ],
        out_specs=full((3 * Bp, D)),
    )(img_x, txt_x,
      bf16(ip["w1"]), ip["b1"], bf16(ip["w2"]), ip["b2"],
      bf16(tp["w1"]), tp["b1"], bf16(tp["w2"]), tp["b2"])

    img_emb = out[:B]
    pos_emb = out[Bp:Bp + B]
    neg_emb = out[2 * Bp:2 * Bp + B]
    return img_emb, pos_emb, neg_emb


# ----------------------------------------------------------------------------
# Parameter construction (deterministic, synthetic — no checkpoint load)
# ----------------------------------------------------------------------------
def init_mlp_params(key, in_dim, hidden_dim, out_dim):
    k1, k2 = jax.random.split(key)
    scale1 = 1.0 / jnp.sqrt(jnp.float32(in_dim))
    scale2 = 1.0 / jnp.sqrt(jnp.float32(hidden_dim))
    return {
        "w1": jax.random.normal(k1, (in_dim, hidden_dim), jnp.float32) * scale1,
        "b1": jnp.zeros((1, hidden_dim), jnp.float32),
        "w2": jax.random.normal(k2, (hidden_dim, out_dim), jnp.float32) * scale2,
        "b2": jnp.zeros((1, out_dim), jnp.float32),
    }


# ----------------------------------------------------------------------------
# TripletImage2Text forward (mirrors the PyTorch module semantics)
# ----------------------------------------------------------------------------
class TripletImage2Text:
    def __init__(self, text_params, image_params, margin=1.0):
        self.text_params = text_params
        self.image_params = image_params
        self.margin = margin  # kept for parity with the PyTorch module (unused in forward)

    def forward(self, img, positive_text, negative_text):
        B = img.shape[0]
        img_feat = img.reshape(B, -1)  # NCHW -> (B, C*H*W), row-major
        return triplet_forward(img_feat, positive_text, negative_text,
                               self.image_params, self.text_params)

    def get_embedding_pair(self, img, text):
        # Reuse the fused triplet kernel with text on both text slots.
        img_emb, txt_emb, _ = self.forward(img, text, text)
        return (img_emb, txt_emb)


# ----------------------------------------------------------------------------
if __name__ == "__main__":
    # Small shapes consistent with the forward:
    #   image: NCHW = (2, 4, 16, 16)  -> flattened feat dim 1024
    #   text features: (2, 256); hidden = 128, embedding dim = 128 (lane-aligned)
    B, C, Himg, Wimg = 2, 4, 16, 16
    TEXT_FEAT = 256
    HIDDEN = 128
    EMBED = 128

    key = jax.random.PRNGKey(0)
    k_img, k_ptxt, k_ntxt, k_imgnet, k_txtnet = jax.random.split(key, 5)

    img = jax.random.normal(k_img, (B, C, Himg, Wimg), jnp.float32)
    positive_text = jax.random.normal(k_ptxt, (B, TEXT_FEAT), jnp.float32)
    negative_text = jax.random.normal(k_ntxt, (B, TEXT_FEAT), jnp.float32)

    image_params = init_mlp_params(k_imgnet, C * Himg * Wimg, HIDDEN, EMBED)
    text_params = init_mlp_params(k_txtnet, TEXT_FEAT, HIDDEN, EMBED)

    model = TripletImage2Text(text_params, image_params, margin=1.0)

    img_emb, pos_emb, neg_emb = model.forward(img, positive_text, negative_text)
    jax.block_until_ready((img_emb, pos_emb, neg_emb))

    assert img_emb.shape == (B, EMBED)
    assert pos_emb.shape == (B, EMBED)
    assert neg_emb.shape == (B, EMBED)

    # Reference with the same bf16 rounding on activations/weights but f32
    # accumulation (matches the kernel's MXU math).
    def ref_mlp(x, p):
        bf = lambda a: a.astype(jnp.bfloat16).astype(jnp.float32)
        h = jnp.maximum(bf(x) @ bf(p["w1"]) + p["b1"], 0.0)
        return bf(h) @ bf(p["w2"]) + p["b2"]

    ref_img = ref_mlp(img.reshape(B, -1), image_params)
    ref_pos = ref_mlp(positive_text, text_params)
    ref_neg = ref_mlp(negative_text, text_params)
    assert jnp.allclose(img_emb, ref_img, atol=2e-2, rtol=2e-2)
    assert jnp.allclose(pos_emb, ref_pos, atol=2e-2, rtol=2e-2)
    assert jnp.allclose(neg_emb, ref_neg, atol=2e-2, rtol=2e-2)

    # Also exercise get_embedding_pair once.
    ie, te = model.get_embedding_pair(img, positive_text)
    jax.block_until_ready((ie, te))
    assert ie.shape == (B, EMBED) and te.shape == (B, EMBED)

    print("KERNEL_OK")
</pallas_src>

<mosaic_0001>
module attributes {stable_mosaic.version = 11 : i64} {
  func.func @_triplet_kernel(%arg0: memref<8x1024xbf16, #tpu.memory_space<vmem>>, %arg1: memref<16x256xbf16, #tpu.memory_space<vmem>>, %arg2: memref<1024x128xbf16, #tpu.memory_space<vmem>>, %arg3: memref<1x128xf32, #tpu.memory_space<vmem>>, %arg4: memref<128x128xbf16, #tpu.memory_space<vmem>>, %arg5: memref<1x128xf32, #tpu.memory_space<vmem>>, %arg6: memref<256x128xbf16, #tpu.memory_space<vmem>>, %arg7: memref<1x128xf32, #tpu.memory_space<vmem>>, %arg8: memref<128x128xbf16, #tpu.memory_space<vmem>>, %arg9: memref<1x128xf32, #tpu.memory_space<vmem>>, %arg10: memref<24x128xf32, #tpu.memory_space<vmem>>) attributes {dimension_semantics = [], scalar_prefetch = 0 : i64, scratch_operands = 0 : i64, tpu.core_type = #tpu.core_type<tc>} {
    %c0 = arith.constant 0 : index
    %c0_0 = arith.constant 0 : index
    %0 = vector.load %arg0[%c0, %c0_0] : memref<8x1024xbf16, #tpu.memory_space<vmem>>, vector<8x1024xbf16>
    %c0_1 = arith.constant 0 : index
    %c0_2 = arith.constant 0 : index
    %1 = vector.load %arg2[%c0_1, %c0_2] : memref<1024x128xbf16, #tpu.memory_space<vmem>>, vector<1024x128xbf16>
    %cst = arith.constant dense<0.000000e+00> : vector<8x128xf32>
    %2 = tpu.matmul %0, %1, %cst {dimension_numbers = #tpu.dot_dimension_numbers<[1], [0], [0], [1], [0, 0, 1, 1], [], []>} : vector<8x1024xbf16>, vector<1024x128xbf16>, vector<8x128xf32> -> vector<8x128xf32>
    %c0_3 = arith.constant 0 : index
    %c0_4 = arith.constant 0 : index
    %3 = vector.load %arg3[%c0_3, %c0_4] : memref<1x128xf32, #tpu.memory_space<vmem>>, vector<1x128xf32>
    %4 = vector.broadcast %3 : vector<1x128xf32> to vector<8x128xf32>
    %5 = arith.addf %2, %4 : vector<8x128xf32>
    %cst_5 = arith.constant 0.000000e+00 : f32
    %6 = vector.broadcast %cst_5 : f32 to vector<8x128xf32>
    %7 = arith.maximumf %5, %6 : vector<8x128xf32>
    %8 = arith.truncf %7 : vector<8x128xf32> to vector<8x128xbf16>
    %c0_6 = arith.constant 0 : index
    %c0_7 = arith.constant 0 : index
    %9 = vector.load %arg4[%c0_6, %c0_7] : memref<128x128xbf16, #tpu.memory_space<vmem>>, vector<128x128xbf16>
    %cst_8 = arith.constant dense<0.000000e+00> : vector<8x128xf32>
    %10 = tpu.matmul %8, %9, %cst_8 {dimension_numbers = #tpu.dot_dimension_numbers<[1], [0], [0], [1], [0, 0, 1, 1], [], []>} : vector<8x128xbf16>, vector<128x128xbf16>, vector<8x128xf32> -> vector<8x128xf32>
    %c0_9 = arith.constant 0 : index
    %c0_10 = arith.constant 0 : index
    %11 = vector.load %arg5[%c0_9, %c0_10] : memref<1x128xf32, #tpu.memory_space<vmem>>, vector<1x128xf32>
    %12 = vector.broadcast %11 : vector<1x128xf32> to vector<8x128xf32>
    %13 = arith.addf %10, %12 : vector<8x128xf32>
    %c0_11 = arith.constant 0 : index
    %c0_12 = arith.constant 0 : index
    %14 = vector.load %arg10[%c0_11, %c0_12] : memref<24x128xf32, #tpu.memory_space<vmem>>, vector<8x128xf32>
    tpu.vector_store %arg10[%c0_11, %c0_12], %13 {strides = array<i32>} : memref<24x128xf32, #tpu.memory_space<vmem>>, vector<8x128xf32>,
    %c0_13 = arith.constant 0 : index
    %c0_14 = arith.constant 0 : index
    %15 = vector.load %arg1[%c0_13, %c0_14] : memref<16x256xbf16, #tpu.memory_space<vmem>>, vector<16x256xbf16>
    %c0_15 = arith.constant 0 : index
    %c0_16 = arith.constant 0 : index
    %16 = vector.load %arg6[%c0_15, %c0_16] : memref<256x128xbf16, #tpu.memory_space<vmem>>, vector<256x128xbf16>
    %cst_17 = arith.constant dense<0.000000e+00> : vector<16x128xf32>
    %17 = tpu.matmul %15, %16, %cst_17 {dimension_numbers = #tpu.dot_dimension_numbers<[1], [0], [0], [1], [0, 0, 1, 1], [], []>} : vector<16x256xbf16>, vector<256x128xbf16>, vector<16x128xf32> -> vector<16x128xf32>
    %c0_18 = arith.constant 0 : index
    %c0_19 = arith.constant 0 : index
    %18 = vector.load %arg7[%c0_18, %c0_19] : memref<1x128xf32, #tpu.memory_space<vmem>>, vector<1x128xf32>
    %19 = vector.broadcast %18 : vector<1x128xf32> to vector<16x128xf32>
    %20 = arith.addf %17, %19 : vector<16x128xf32>
    %cst_20 = arith.constant 0.000000e+00 : f32
    %21 = vector.broadcast %cst_20 : f32 to vector<16x128xf32>
    %22 = arith.maximumf %20, %21 : vector<16x128xf32>
    %23 = arith.truncf %22 : vector<16x128xf32> to vector<16x128xbf16>
    %c0_21 = arith.constant 0 : index
    %c0_22 = arith.constant 0 : index
    %24 = vector.load %arg8[%c0_21, %c0_22] : memref<128x128xbf16, #tpu.memory_space<vmem>>, vector<128x128xbf16>
    %cst_23 = arith.constant dense<0.000000e+00> : vector<16x128xf32>
    %25 = tpu.matmul %23, %24, %cst_23 {dimension_numbers = #tpu.dot_dimension_numbers<[1], [0], [0], [1], [0, 0, 1, 1], [], []>} : vector<16x128xbf16>, vector<128x128xbf16>, vector<16x128xf32> -> vector<16x128xf32>
    %c0_24 = arith.constant 0 : index
    %c0_25 = arith.constant 0 : index
    %26 = vector.load %arg9[%c0_24, %c0_25] : memref<1x128xf32, #tpu.memory_space<vmem>>, vector<1x128xf32>
    %27 = vector.broadcast %26 : vector<1x128xf32> to vector<16x128xf32>
    %28 = arith.addf %25, %27 : vector<16x128xf32>
    %c8 = arith.constant 8 : index
    %c0_26 = arith.constant 0 : index
    %29 = vector.load %arg10[%c8, %c0_26] : memref<24x128xf32, #tpu.memory_space<vmem>>, vector<16x128xf32>
    tpu.vector_store %arg10[%c8, %c0_26], %28 {strides = array<i32>} : memref<24x128xf32, #tpu.memory_space<vmem>>, vector<16x128xf32>,
    return
  }
}

</mosaic_0001>

<bundles_post_ra>
// kernel: tpu_custom_call.1
= control target key start
LH: loop header
LB: loop body
LE: loop exit
PB: predicated region body
PF: predicated region fallthrough
CT: control target
= control target key end

     0   :  { %15 = vsyncpa [#allocation3], 0  ;;  %s2031_s0 = inlined_call_operand.hbm [shape: bf16[8,1024], index: 0, kind: input, shape index: {}]   ;;  %s2032_s1 = inlined_call_operand.hbm [shape: bf16[16,256], index: 1, kind: input, shape index: {}]   ;;  %s2033_s2 = inlined_call_operand.hbm [shape: bf16[1024,128], index: 2, kind: input, shape index: {}]   ;;  %s2034_s3 = inlined_call_operand.vmem [shape: f32[1,128], index: 3, kind: input, shape index: {}]   ;;  %s2035_s4 = inlined_call_operand.hbm [shape: bf16[128,128], index: 4, kind: input, shape index: {}]   ;;  %s2036_s5 = inlined_call_operand.vmem [shape: f32[1,128], index: 5, kind: input, shape index: {}]   ;;  %s2037_s6 = inlined_call_operand.hbm [shape: bf16[256,128], index: 6, kind: input, shape index: {}]   ;;  %s2038_s7 = inlined_call_operand.vmem [shape: f32[1,128], index: 7, kind: input, shape index: {}]   ;;  %s2039_s8 = inlined_call_operand.hbm [shape: bf16[128,128], index: 8, kind: input, shape index: {}]   ;;  %s2040_s9 = inlined_call_operand.vmem [shape: f32[1,128], index: 9, kind: input, shape index: {}]   ;;  %s2041_s10 = inlined_call_operand.hbm [shape: f32[24,128], index: 10, kind: output, shape index: {}]  }
   0x1   :  { %16 = vsyncpa [#allocation6], 0 }
   0x2   :  { %17 = vsyncpa [#allocation9], 0 }
   0x3   :  { %18 = vsyncpa [#allocation12], 0 }
   0x4   :  { %19 = vsyncpa [#allocation4], 0  ;;  %s1829_s13 = smov [#allocation5]   ;;  %s1665_s17 = scalar_lea.hbm %s2032_s1, 256 }
   0x5   :  { %s35_s14 = sshll.u32 %s1829_s13, 4  ;;  %p1666_p0 = scmp.ne.s32.totalorder %s2032_s1, %s1665_s17  ;;  %s36_s14 = int_to_ptr.vmem [resolvable:$true] %s35_s14 }
   0x6   :  { %p1669_p1 = scmp.lt.u32.totalorder %s1665_s17, %s2032_s1 }
   0x8   :  { %p1671_p2 = pnand %p1669_p1, %p1666_p0 }
   0xa   :  { %1674 = shalt.err (!%p1671_p2)
}
   0xb   :  { %s1675_s22 = scalar_lea.vmem %s36_s14, 256  ;;  %p1680_p4 = scmp.lt.s32.totalorder %s36_s14, %s36_s14 }
   0xc   :  { %p1676_p3 = scmp.ne.s32.totalorder %s36_s14, %s1675_s22  ;;  %p1681_p5 = scmp.lt.s32.totalorder %s1675_s22, %s1675_s22 }
   0xe   :  { %p1682_p6 = por %p1681_p5, %p1680_p4 }
  0x10   :  { %p1683_p7 = pnand %p1682_p6, %p1676_p3 }
  0x12   :  { %1686 = shalt.err (!%p1683_p7)
}
  0x13   :  { %s1830_s23 = smov 128   ;;  %s1831_s24 = smov 8  }
  0x14   :  { %41 = dma.hbm_to_vmem [thread:$0]  %s2032_s1, 256, %s36_s14, [#allocation6], %s1830_s23, %s1830_s23, %s1831_s24  }
  0x15   :  { %s1832_s27 = smov [#allocation8]   ;;  %s1833_s29 = smov [#allocation2]  }
  0x16   :  { %s61_s28 = sshll.u32 %s1832_s27, 4  ;;  %s26_s30 = sshll.u32 %s1833_s29, 4  ;;  %s62_s28 = int_to_ptr.vmem [resolvable:$true] %s61_s28  ;;  %s27_s30 = int_to_ptr.vmem [resolvable:$true] %s26_s30 }
  0x17   :  { %s1687_s13 = scalar_lea.hbm %s2035_s4, 1024 }
  0x18   :  { %p1688_p8 = scmp.ne.s32.totalorder %s2035_s4, %s1687_s13  ;;  %p1691_p9 = scmp.lt.u32.totalorder %s1687_s13, %s2035_s4 }
  0x1a   :  { %p1693_p10 = pnand %p1691_p9, %p1688_p8 }
  0x1c   :  { %1696 = shalt.err (!%p1693_p10)
}
  0x1d   :  { %s1697_s1 = scalar_lea.vmem %s62_s28, 1024  ;;  %p1702_p12 = scmp.lt.s32.totalorder %s62_s28, %s62_s28 }
  0x1e   :  { %p1698_p11 = scmp.ne.s32.totalorder %s62_s28, %s1697_s1  ;;  %p1703_p13 = scmp.lt.s32.totalorder %s1697_s1, %s1697_s1 }
  0x20   :  { %p1704_p0 = por %p1703_p13, %p1702_p12 }
  0x22   :  { %p1705_p1 = pnand %p1704_p0, %p1698_p11 }
  0x24   :  { %1708 = shalt.err (!%p1705_p1)
}
  0x25   :  { %s1834_s14 = smov 64   ;;  %s1835_s19 = smov 4  }
  0x26   :  { %67 = dma.hbm_to_vmem [thread:$0]  %s2035_s4, 1024, %s62_s28, [#allocation9], %s1834_s14, %s1834_s14, %s1835_s19  }
  0x27   :  { %s1709_s26 = scalar_lea.hbm %s2031_s0, 512 }
  0x28   :  { %p1710_p2 = scmp.ne.s32.totalorder %s2031_s0, %s1709_s26  ;;  %p1713_p3 = scmp.lt.u32.totalorder %s1709_s26, %s2031_s0 }
  0x2a   :  { %p1715_p4 = pnand %p1713_p3, %p1710_p2 }
  0x2c   :  { %1718 = shalt.err (!%p1715_p4)
}
  0x2d   :  { %s1719_s13 = scalar_lea.vmem %s27_s30, 512  ;;  %p1724_p6 = scmp.lt.s32.totalorder %s27_s30, %s27_s30 }
  0x2e   :  { %p1720_p5 = scmp.ne.s32.totalorder %s27_s30, %s1719_s13  ;;  %p1725_p7 = scmp.lt.s32.totalorder %s1719_s13, %s1719_s13 }
  0x30   :  { %p1726_p8 = por %p1725_p7, %p1724_p6 }
  0x32   :  { %p1727_p9 = pnand %p1726_p8, %p1720_p5 }
  0x34   :  { %1730 = shalt.err (!%p1727_p9)
}
  0x35   :  { %29 = dma.hbm_to_vmem [thread:$0]  %s2031_s0, 512, %s27_s30, [#allocation3]  }
  0x36   :  { %s1836_s15 = smov [#allocation7]   ;;  %s1837_s17 = smov [#allocation10]  }
  0x37   :  { %s47_s16 = sshll.u32 %s1836_s15, 4  ;;  %s75_s18 = sshll.u32 %s1837_s17, 4  ;;  %s48_s16 = int_to_ptr.vmem [resolvable:$true] %s47_s16  ;;  %s76_s18 = int_to_ptr.vmem [resolvable:$true] %s75_s18 }
  0x38   :  { %s1731_s21 = scalar_lea.hbm %s2033_s2, 8192 }
  0x39   :  { %p1732_p10 = scmp.ne.s32.totalorder %s2033_s2, %s1731_s21  ;;  %p1735_p11 = scmp.lt.u32.totalorder %s1731_s21, %s2033_s2 }
  0x3b   :  { %p1737_p12 = pnand %p1735_p11, %p1732_p10 }
  0x3d   :  { %1740 = shalt.err (!%p1737_p12)
}
  0x3e   :  { %s1741_s0 = scalar_lea.vmem %s48_s16, 8192  ;;  %p1746_p0 = scmp.lt.s32.totalorder %s48_s16, %s48_s16 }
  0x3f   :  { %p1742_p13 = scmp.ne.s32.totalorder %s48_s16, %s1741_s0  ;;  %p1747_p1 = scmp.lt.s32.totalorder %s1741_s0, %s1741_s0 }
  0x41   :  { %p1748_p2 = por %p1747_p1, %p1746_p0 }
  0x43   :  { %p1749_p3 = pnand %p1748_p2, %p1742_p13 }
  0x45   :  { %1752 = shalt.err (!%p1749_p3)
}
  0x46   :  { %53 = dma.hbm_to_vmem [thread:$0]  %s2033_s2, 8192, %s48_s16, [#allocation6], %s1834_s14, %s1834_s14, %s1835_s19  }
  0x47   :  { %s1753_s13 = scalar_lea.hbm %s2037_s6, 2048 }
  0x48   :  { %p1754_p4 = scmp.ne.s32.totalorder %s2037_s6, %s1753_s13  ;;  %p1757_p5 = scmp.lt.u32.totalorder %s1753_s13, %s2037_s6 }
  0x4a   :  { %p1759_p6 = pnand %p1757_p5, %p1754_p4 }
  0x4c   :  { %1762 = shalt.err (!%p1759_p6)
}
  0x4d   :  { %s1763_s1 = scalar_lea.vmem %s76_s18, 2048  ;;  %p1768_p8 = scmp.lt.s32.totalorder %s76_s18, %s76_s18 }
  0x4e   :  { %p1764_p7 = scmp.ne.s32.totalorder %s76_s18, %s1763_s1  ;;  %p1769_p9 = scmp.lt.s32.totalorder %s1763_s1, %s1763_s1 }
  0x50   :  { %p1770_p10 = por %p1769_p9, %p1768_p8 }
  0x52   :  { %p1771_p11 = pnand %p1770_p10, %p1764_p7 }
  0x54   :  { %1774 = shalt.err (!%p1771_p11)
}
  0x55   :  { %81 = dma.hbm_to_vmem [thread:$0]  %s2037_s6, 2048, %s76_s18, [#allocation9], %s1834_s14, %s1834_s14, %s1835_s19  }
  0x56   :  { %s1838_s20 = smov [#allocation11]   ;;  %s1775_s26 = scalar_lea.hbm %s2039_s8, 1024 }
  0x57   :  { %s89_s21 = sshll.u32 %s1838_s20, 4  ;;  %p1776_p12 = scmp.ne.s32.totalorder %s2039_s8, %s1775_s26  ;;  %s90_s21 = int_to_ptr.vmem [resolvable:$true] %s89_s21 }
  0x58   :  { %p1779_p13 = scmp.lt.u32.totalorder %s1775_s26, %s2039_s8 }
  0x5a   :  { %p1781_p0 = pnand %p1779_p13, %p1776_p12 }
  0x5c   :  { %1784 = shalt.err (!%p1781_p0)
}
  0x5d   :  { %s1785_s11 = scalar_lea.vmem %s90_s21, 1024  ;;  %p1790_p2 = scmp.lt.s32.totalorder %s90_s21, %s90_s21 }
  0x5e   :  { %p1786_p1 = scmp.ne.s32.totalorder %s90_s21, %s1785_s11  ;;  %p1791_p3 = scmp.lt.s32.totalorder %s1785_s11, %s1785_s11 }
  0x60   :  { %p1792_p4 = por %p1791_p3, %p1790_p2 }
  0x62   :  { %p1793_p5 = pnand %p1792_p4, %p1786_p1 }
  0x64   :  { %1796 = shalt.err (!%p1793_p5)
}
  0x65   :  { %95 = dma.hbm_to_vmem [thread:$0]  %s2039_s8, 1024, %s90_s21, [#allocation12], %s1834_s14, %s1834_s14, %s1835_s19  }
  0x66   :  { %1819 = dma.done.wait [#allocation3], 512  }
  0x67   :  { %1820 = vsyncadd [#allocation3], 4294966784 }
  0x68   :  { %1821 = dma.done.wait [#allocation6], 8448  }
  0x69   :  { %1822 = vsyncadd [#allocation6], 4294958848 }
  0x6a   :  { %1823 = dma.done.wait [#allocation9], 3072  }
  0x6b   :  { %1824 = vsyncadd [#allocation9], 4294964224 }
  0x6c   :  { %1825 = dma.done.wait [#allocation12], 1024  }
  0x6d   :  { %1826 = vsyncadd [#allocation12], 4294966272  ;;  %v1558_v0 = vld [vmem:[#allocation7 + $0x40] sm:$0xff]   ;;  %v1562_v4 = vld [vmem:[#allocation7 + $0x48] sm:$0xff]   ;;  %vm1840_vm0 = vmmov 0   ;;  %s1841_s28 = smov [#allocation13]  }
  0x6e   :  { %v1559_v1 = vld [vmem:[#allocation7 + $0xc0] sm:$0xff]   ;;  %1377 = vmatprep.subr.bf16.mxu0 %v1558_v0  ;;  %v1563_v5 = vld [vmem:[#allocation7 + $0xc8] sm:$0xff]   ;;  %v1566_v8 = vld [vmem:[#allocation7 + $0x50] sm:$0xff]   ;;  %s1252_s15 = sshll.u32 %s1841_s28, 4  ;;  %s1253_s15 = int_to_ptr.vmem [resolvable:$true] %s1252_s15 }
  0x6f   :  { %v1560_v2 = vld [vmem:[#allocation7] sm:$0xff]   ;;  %1399 = vmatprep.subr.bf16.mxu1 %v1559_v1  ;;  %v1564_v6 = vld [vmem:[#allocation7 + $0x8] sm:$0xff]   ;;  %v1567_v9 = vld [vmem:[#allocation7 + $0xd0] sm:$0xff]   ;;  %p1802_p7 = scmp.lt.s32.totalorder %s1253_s15, %s1253_s15 }
  0x70   :  { %v1561_v3 = vld [vmem:[#allocation7 + $0x80] sm:$0xff]   ;;  %1378 = vmatpush3.bf16.msra.mxu0 %v1560_v2  ;;  %v1565_v7 = vld [vmem:[#allocation7 + $0x88] sm:$0xff]   ;;  %v1568_v10 = vld [vmem:[#allocation7 + $0x10] sm:$0xff]  }
  0x71   :  { %1400 = vmatpush3.bf16.msra.mxu1 %v1561_v3  ;;  %1379 = vmatprep.subr.bf16.mxu0 %v1562_v4  ;;  %v1569_v11 = vld [vmem:[#allocation7 + $0x90] sm:$0xff]   ;;  %v1570_v12 = vld [vmem:[#allocation7 + $0x58] sm:$0xff]   ;;  %v1574_v16 = vld [vmem:[#allocation7 + $0x60] sm:$0xff]  }
  0x72   :  { %1401 = vmatprep.subr.bf16.mxu1 %v1563_v5  ;;  %v1571_v13 = vld [vmem:[#allocation7 + $0xd8] sm:$0xff]   ;;  %v1575_v17 = vld [vmem:[#allocation7 + $0xe0] sm:$0xff]   ;;  %v1578_v20 = vld [vmem:[#allocation7 + $0x68] sm:$0xff]  }
  0x73   :  { %v1572_v14 = vld [vmem:[#allocation7 + $0x18] sm:$0xff]   ;;  %v1576_v18 = vld [vmem:[#allocation7 + $0x20] sm:$0xff]   ;;  %v1579_v21 = vld [vmem:[#allocation7 + $0xe8] sm:$0xff]  }
  0x74   :  { %1380 = vmatpush3.bf16.msra.mxu0 %v1564_v6  ;;  %v1573_v15 = vld [vmem:[#allocation7 + $0x98] sm:$0xff]   ;;  %v1577_v19 = vld [vmem:[#allocation7 + $0xa0] sm:$0xff]   ;;  %v1580_v22 = vld [vmem:[#allocation7 + $0x28] sm:$0xff]  }
  0x75   :  { %1402 = vmatpush3.bf16.msra.mxu1 %v1565_v7  ;;  %1381 = vmatprep.subr.bf16.mxu0 %v1566_v8  ;;  %v1581_v23 = vld [vmem:[#allocation7 + $0xa8] sm:$0xff]   ;;  %v1582_v24 = vld [vmem:[#allocation7 + $0x70] sm:$0xff]   ;;  %v1586_v28 = vld [vmem:[#allocation7 + $0x78] sm:$0xff]  }
  0x76   :  { %1403 = vmatprep.subr.bf16.mxu1 %v1567_v9  ;;  %v1583_v25 = vld [vmem:[#allocation7 + $0xf0] sm:$0xff]   ;;  %v1587_v29 = vld [vmem:[#allocation7 + $0xf8] sm:$0xff]   ;;  %v1594_v38 = vld [vmem:[#allocation7 + $0x140] sm:$0xff]  }
  0x77   :  { %v1584_v26 = vld [vmem:[#allocation7 + $0x30] sm:$0xff]   ;;  %v1588_v30 = vld [vmem:[#allocation7 + $0x38] sm:$0xff]   ;;  %v1595_v39 = vld [vmem:[#allocation7 + $0x1c0] sm:$0xff]  }
  0x78   :  { %1382 = vmatpush3.bf16.msra.mxu0 %v1568_v10  ;;  %v1585_v27 = vld [vmem:[#allocation7 + $0xb0] sm:$0xff]   ;;  %v1589_v31 = vld [vmem:[#allocation7 + $0xb8] sm:$0xff]   ;;  %v1596_v40 = vld [vmem:[#allocation7 + $0x100] sm:$0xff]  }
  0x79   :  { %1404 = vmatpush3.bf16.msra.mxu1 %v1569_v11  ;;  %1383 = vmatprep.subr.bf16.mxu0 %v1570_v12  ;;  %v117_v32 = vld [vmem:[#allocation2] sm:$0xff]  ;;  %v118_v33 = vld [vmem:[#allocation2 + $0x8] sm:$0xff]  ;;  %v1597_v41 = vld [vmem:[#allocation7 + $0x180] sm:$0xff]  }
  0x7a   :  { %1405 = vmatprep.subr.bf16.mxu1 %v1571_v13  ;;  %v1268_v34 = vcombine.low %v117_v32, %v117_v32  ;;  %v1269_v35 = vcombine.high %v117_v32, %v117_v32  ;;  %v1270_v36 = vcombine.low %v118_v33, %v118_v33  ;;  %v1271_v37 = vcombine.high %v118_v33, %v118_v33  ;;  %v1598_v42 = vld [vmem:[#allocation7 + $0x148] sm:$0xff]   ;;  %v1602_v46 = vld [vmem:[#allocation7 + $0x150] sm:$0xff]   ;;  %v1606_v50 = vld [vmem:[#allocation7 + $0x158] sm:$0xff]  }
  0x7b   :  { %v1599_v43 = vld [vmem:[#allocation7 + $0x1c8] sm:$0xff]   ;;  %v1603_v47 = vld [vmem:[#allocation7 + $0x1d0] sm:$0xff]   ;;  %v1607_v51 = vld [vmem:[#allocation7 + $0x1d8] sm:$0xff]  }
  0x7c   :  { %1384 = vmatpush3.bf16.msra.mxu0 %v1572_v14  ;;  %700 = vmatprep.mubr.bf16.mxu0 %v1269_v35  ;;  %v1600_v44 = vld [vmem:[#allocation7 + $0x108] sm:$0xff]   ;;  %v1604_v48 = vld [vmem:[#allocation7 + $0x110] sm:$0xff]   ;;  %v1608_v52 = vld [vmem:[#allocation7 + $0x118] sm:$0xff]  }
  0x7d   :  { %1406 = vmatpush3.bf16.msra.mxu1 %v1573_v15  ;;  %1385 = vmatprep.subr.bf16.mxu0 %v1574_v16  ;;  %v1601_v45 = vld [vmem:[#allocation7 + $0x188] sm:$0xff]   ;;  %v1605_v49 = vld [vmem:[#allocation7 + $0x190] sm:$0xff]   ;;  %v1609_v53 = vld [vmem:[#allocation7 + $0x198] sm:$0xff]  }
  0x7e   :  { %1407 = vmatprep.subr.bf16.mxu1 %v1575_v17  ;;  %740 = vmatprep.mubr.bf16.mxu1 %v1271_v37  ;;  %v1610_v54 = vld [vmem:[#allocation7 + $0x160] sm:$0xff]   ;;  %v1614_v58 = vld [vmem:[#allocation7 + $0x168] sm:$0xff]   ;;  %v1618_v62 = vld [vmem:[#allocation7 + $0x170] sm:$0xff]  }
  0x7f   :  { %v1611_v55 = vld [vmem:[#allocation7 + $0x1e0] sm:$0xff]   ;;  %v1615_v59 = vld [vmem:[#allocation7 + $0x1e8] sm:$0xff]   ;;  %v1619_v63 = vld [vmem:[#allocation7 + $0x1f0] sm:$0xff]  }
  0x80   :  { %1386 = vmatpush3.bf16.msra.mxu0 %v1576_v18  ;;  %v1612_v56 = vld [vmem:[#allocation7 + $0x120] sm:$0xff]   ;;  %v1616_v60 = vld [vmem:[#allocation7 + $0x128] sm:$0xff]   ;;  %v1620_v0 = vld [vmem:[#allocation7 + $0x130] sm:$0xff]  }
  0x81   :  { %1408 = vmatpush3.bf16.msra.mxu1 %v1577_v19  ;;  %1387 = vmatprep.subr.bf16.mxu0 %v1578_v20  ;;  %v1613_v57 = vld [vmem:[#allocation7 + $0x1a0] sm:$0xff]   ;;  %v1617_v61 = vld [vmem:[#allocation7 + $0x1a8] sm:$0xff]   ;;  %v1621_v1 = vld [vmem:[#allocation7 + $0x1b0] sm:$0xff]  }
  0x82   :  { %1409 = vmatprep.subr.bf16.mxu1 %v1579_v21  ;;  %v1622_v2 = vld [vmem:[#allocation7 + $0x178] sm:$0xff]   ;;  %v119_v6 = vld [vmem:[#allocation2 + $0x10] sm:$0xff]  ;;  %v120_v9 = vld [vmem:[#allocation2 + $0x18] sm:$0xff] }
  0x83   :  { %v1623_v3 = vld [vmem:[#allocation7 + $0x1f8] sm:$0xff]   ;;  %v1272_v7 = vcombine.low %v119_v6, %v119_v6  ;;  %v1273_v8 = vcombine.high %v119_v6, %v119_v6  ;;  %v1274_v10 = vcombine.low %v120_v9, %v120_v9  ;;  %v1275_v11 = vcombine.high %v120_v9, %v120_v9  ;;  %v1630_v12 = vld [vmem:[#allocation10 + $0x40] sm:$0xff]   ;;  %v1632_v14 = vld [vmem:[#allocation10 + $0x48] sm:$0xff]  }
  0x84   :  { %1388 = vmatpush3.bf16.msra.mxu0 %v1580_v22  ;;  %v1624_v4 = vld [vmem:[#allocation7 + $0x138] sm:$0xff]   ;;  %v1631_v13 = vld [vmem:[#allocation10] sm:$0xff]   ;;  %v1633_v15 = vld [vmem:[#allocation10 + $0x8] sm:$0xff]  }
  0x85   :  { %1410 = vmatpush3.bf16.msra.mxu1 %v1581_v23  ;;  %1389 = vmatprep.subr.bf16.mxu0 %v1582_v24  ;;  %v1625_v5 = vld [vmem:[#allocation7 + $0x1b8] sm:$0xff]   ;;  %v1634_v16 = vld [vmem:[#allocation10 + $0x50] sm:$0xff]   ;;  %v1638_v20 = vld [vmem:[#allocation10 + $0x60] sm:$0xff]  }
  0x86   :  { %1411 = vmatprep.subr.bf16.mxu1 %v1583_v25  ;;  %v1635_v17 = vld [vmem:[#allocation10 + $0x10] sm:$0xff]   ;;  %v1636_v18 = vld [vmem:[#allocation10 + $0x58] sm:$0xff]   ;;  %v1639_v21 = vld [vmem:[#allocation10 + $0x20] sm:$0xff]  }
  0x87   :  { %v1637_v19 = vld [vmem:[#allocation10 + $0x18] sm:$0xff]   ;;  %v1640_v22 = vld [vmem:[#allocation10 + $0x68] sm:$0xff]   ;;  %v1642_v25 = vld [vmem:[#allocation10 + $0x70] sm:$0xff]  }
  0x88   :  { %1390 = vmatpush3.bf16.msra.mxu0 %v1584_v26  ;;  %v1648_v23 = vld [vmem:[#allocation5 + $0x4] ss:$8 sps:$4 sm:$0xff]   ;;  %v1641_v24 = vld [vmem:[#allocation10 + $0x28] sm:$0xff]   ;;  %v1653_v35 = vld [vmem:[#allocation8 + $0x20] sm:$0xff]  }
  0x89   :  { %1412 = vmatpush3.bf16.msra.mxu1 %v1585_v27  ;;  %1391 = vmatprep.subr.bf16.mxu0 %v1586_v28  ;;  %v1643_v26 = vld [vmem:[#allocation10 + $0x30] sm:$0xff]   ;;  %v1644_v27 = vld [vmem:[#allocation10 + $0x78] sm:$0xff]   ;;  %v1650_v32 = vld [vmem:[#allocation8 + $0x8] sm:$0xff]  }
  0x8a   :  { %1413 = vmatprep.subr.bf16.mxu1 %v1587_v29  ;;  %v1645_v28 = vld [vmem:[#allocation10 + $0x38] sm:$0xff]   ;;  %v1651_v33 = vld [vmem:[#allocation8 + $0x10] sm:$0xff]   ;;  %v1661_v6 = vld [vmem:[#allocation11 + $0x20] sm:$0xff]  }
  0x8b   :  { %v1646_v29 = vld [vmem:[#allocation5] ss:$8 sps:$4 sm:$0xff]  }
  0x8c   :  { %1392 = vmatpush3.bf16.msra.mxu0 %v1588_v30  ;;  %v1649_v30 = vld [vmem:[#allocation8] sm:$0xff]   ;;  %v1655_v37 = vld [vmem:[#allocation8 + $0x30] sm:$0xff]  }
  0x8d   :  { %1414 = vmatpush3.bf16.msra.mxu1 %v1589_v31  ;;  %1421 = vmatprep.subr.bf16.mxu0 %v1594_v38  ;;  %v1839_v31 = vmov 0.0   ;;  %v1656_v38 = vld [vmem:[#allocation8 + $0x38] sm:$0xff]   ;;  %v1349_v9 = vld [vmem:[%s2038_s7] ss:$0 sm:$0xff] }
  0x8e   :  { %1443 = vmatprep.subr.bf16.mxu1 %v1595_v39 }
  0x8f   :  { %701 = vmatmul.mubr.bf16.vlgmr.msra.gmra.mrb[0].mxu0 %v1268_v34  ;;  %v1652_v34 = vld [vmem:[#allocation8 + $0x18] sm:$0xff]  }
  0x90   :  { %741 = vmatmul.mubr.bf16.vlgmr.msra.gmra.mrb[0].mxu1 %v1270_v36  ;;  %1422 = vmatpush3.bf16.msra.mxu0 %v1596_v40  ;;  %v1654_v36 = vld [vmem:[#allocation8 + $0x28] sm:$0xff]  }
  0x91   :  { %1444 = vmatpush3.bf16.msra.mxu1 %v1597_v41  ;;  %1423 = vmatprep.subr.bf16.mxu0 %v1598_v42  ;;  %v1267_v41 = vld [vmem:[%s2034_s3] ss:$0 sm:$0xff] }
  0x92   :  { %1445 = vmatprep.subr.bf16.mxu1 %v1599_v43  ;;  %780 = vmatprep.mubr.bf16.mxu0 %v1273_v8 }
  0x93   :  { %820 = vmatprep.mubr.bf16.mxu1 %v1275_v11  ;;  %v1663_v11 = vld [vmem:[#allocation11 + $0x30] sm:$0xff]  }
  0x94   :  { %1424 = vmatpush3.bf16.msra.mxu0 %v1600_v44 }
  0x95   :  { %1446 = vmatpush3.bf16.msra.mxu1 %v1601_v45  ;;  %1425 = vmatprep.subr.bf16.mxu0 %v1602_v46 }
  0x96   :  { %1447 = vmatprep.subr.bf16.mxu1 %v1603_v47 }
  0x98   :  { %1426 = vmatpush3.bf16.msra.mxu0 %v1604_v48 }
  0x99   :  { %1448 = vmatpush3.bf16.msra.mxu1 %v1605_v49  ;;  %1427 = vmatprep.subr.bf16.mxu0 %v1606_v50 }
  0x9a   :  { %1449 = vmatprep.subr.bf16.mxu1 %v1607_v51 }
  0x9c   :  { %1428 = vmatpush3.bf16.msra.mxu0 %v1608_v52 }
  0x9d   :  { %1450 = vmatpush3.bf16.msra.mxu1 %v1609_v53  ;;  %1429 = vmatprep.subr.bf16.mxu0 %v1610_v54 }
  0x9e   :  { %1451 = vmatprep.subr.bf16.mxu1 %v1611_v55 }
  0xa0   :  { %1430 = vmatpush3.bf16.msra.mxu0 %v1612_v56 }
  0xa1   :  { %1452 = vmatpush3.bf16.msra.mxu1 %v1613_v57  ;;  %1431 = vmatprep.subr.bf16.mxu0 %v1614_v58 }
  0xa2   :  { %1453 = vmatprep.subr.bf16.mxu1 %v1615_v59 }
  0xa4   :  { %1432 = vmatpush3.bf16.msra.mxu0 %v1616_v60 }
  0xa5   :  { %1454 = vmatpush3.bf16.msra.mxu1 %v1617_v61  ;;  %1433 = vmatprep.subr.bf16.mxu0 %v1618_v62 }
  0xa6   :  { %1455 = vmatprep.subr.bf16.mxu1 %v1619_v63 }
  0xa8   :  { %1434 = vmatpush3.bf16.msra.mxu0 %v1620_v0 }
  0xa9   :  { %1456 = vmatpush3.bf16.msra.mxu1 %v1621_v1  ;;  %1435 = vmatprep.subr.bf16.mxu0 %v1622_v2  ;;  %v1657_v1 = vld [vmem:[#allocation11] sm:$0xff]  }
  0xaa   :  { %1457 = vmatprep.subr.bf16.mxu1 %v1623_v3  ;;  %v1658_v3 = vld [vmem:[#allocation11 + $0x8] sm:$0xff]  }
  0xac   :  { %1436 = vmatpush3.bf16.msra.mxu0 %v1624_v4  ;;  %v1659_v4 = vld [vmem:[#allocation11 + $0x10] sm:$0xff]  }
  0xad   :  { %1458 = vmatpush3.bf16.msra.mxu1 %v1625_v5  ;;  %1505 = vmatprep.subr.bf16.mxu0 %v1839_v31  ;;  %v1660_v5 = vld [vmem:[#allocation11 + $0x18] sm:$0xff]  }
  0xae   :  { %1474 = vmatprep.subr.bf16.mxu1 %v1630_v12 }
  0xaf   :  { %781 = vmatmul.mubr.bf16.vlgmr.msra.gmra.mrb[4].mxu0 %v1272_v7  ;;  %v1662_v7 = vld [vmem:[#allocation11 + $0x28] sm:$0xff]  }
  0xb0   :  { %821 = vmatmul.mubr.bf16.vlgmr.msra.gmra.mrb[4].mxu1 %v1274_v10  ;;  %1506 = vmatpush3.bf16.msra.mxu0 %v1649_v30 }
  0xb1   :  { %1475 = vmatpush3.bf16.msra.mxu1 %v1631_v13  ;;  %1121 = vmatprep.mubr.bf16.mxu1 %v1648_v23 }
  0xb2   :  { %1476 = vmatprep.subr.bf16.mxu1 %v1632_v14  ;;  %1507 = vmatprep.subr.bf16.mxu0 %v1839_v31 }
  0xb3   :  { %1521 = vmatprep.mubr.msk.bf16.mxu0 %vm1840_vm0, %v1839_v31 }
  0xb4   :  { %1508 = vmatpush3.bf16.msra.mxu0 %v1650_v32 }
  0xb5   :  { %1477 = vmatpush3.bf16.msra.mxu1 %v1633_v15  ;;  %1509 = vmatprep.subr.bf16.mxu0 %v1839_v31 }
  0xb6   :  { %1478 = vmatprep.subr.bf16.mxu1 %v1634_v16 }
  0xb8   :  { %1510 = vmatpush3.bf16.msra.mxu0 %v1651_v33 }
  0xb9   :  { %1479 = vmatpush3.bf16.msra.mxu1 %v1635_v17  ;;  %1511 = vmatprep.subr.bf16.mxu0 %v1839_v31  ;;  %v1664_v17 = vld [vmem:[#allocation11 + $0x38] sm:$0xff]  }
  0xba   :  { %1480 = vmatprep.subr.bf16.mxu1 %v1636_v18 }
  0xbc   :  { %1512 = vmatpush3.bf16.msra.mxu0 %v1652_v34 }
  0xbd   :  { %1481 = vmatpush3.bf16.msra.mxu1 %v1637_v19  ;;  %1513 = vmatprep.subr.bf16.mxu0 %v1839_v31 }
  0xbe   :  { %1482 = vmatprep.subr.bf16.mxu1 %v1638_v20 }
  0xc0   :  { %1514 = vmatpush3.bf16.msra.mxu0 %v1653_v35 }
  0xc1   :  { %1483 = vmatpush3.bf16.msra.mxu1 %v1639_v21  ;;  %1515 = vmatprep.subr.bf16.mxu0 %v1839_v31 }
  0xc2   :  { %1484 = vmatprep.subr.bf16.mxu1 %v1640_v22  ;;  %v1340_v22 = vld [vmem:[%s2036_s5] ss:$0 sm:$0xff]  ;;  %s1797_s5 = scalar_lea.vmem %s1253_s15, 384 }
  0xc3   :  { %p1798_p6 = scmp.ne.s32.totalorder %s1253_s15, %s1797_s5  ;;  %p1803_p8 = scmp.lt.s32.totalorder %s1797_s5, %s1797_s5 }
  0xc4   :  { %1516 = vmatpush3.bf16.msra.mxu0 %v1654_v36 }
  0xc5   :  { %1485 = vmatpush3.bf16.msra.mxu1 %v1641_v24  ;;  %1517 = vmatprep.subr.bf16.mxu0 %v1839_v31  ;;  %p1804_p9 = por %p1803_p8, %p1802_p7 }
  0xc6   :  { %1486 = vmatprep.subr.bf16.mxu1 %v1642_v25 }
  0xc7   :  { %p1805_p10 = pnand %p1804_p9, %p1798_p6 }
  0xc8   :  { %1518 = vmatpush3.bf16.msra.mxu0 %v1655_v37 }
  0xc9   :  { %1487 = vmatpush3.bf16.msra.mxu1 %v1643_v26  ;;  %1519 = vmatprep.subr.bf16.mxu0 %v1839_v31 }
  0xca   :  { %1488 = vmatprep.subr.bf16.mxu1 %v1644_v27 }
  0xcc   :  { %1520 = vmatpush3.bf16.msra.mxu0 %v1656_v38 }
  0xcd   :  { %1489 = vmatpush3.bf16.msra.mxu1 %v1645_v28  ;;  %1525 = vmatprep.subr.bf16.mxu0 %v1839_v31  ;;  %v1368_v28 = vld [vmem:[%s2040_s9] ss:$0 sm:$0xff] }
  0xd0   :  { %1122 = vmatmul.mubr.bf16.vlgmr.msra.gmra.mrb[8].mxu1 %v1646_v29 }
 0x162   :  { %v1393_v39 = vpop.f32.mrb[0].mxu0 }
 0x163   :  { %v1415_v40 = vpop.f32.mrb[0].mxu1  ;;  %v1394_v42 = vpop.f32.mrb[1].mxu0 }
 0x164   :  { %v1416_v43 = vpop.f32.mrb[1].mxu1  ;;  %v1395_v44 = vadd.f32 %v1394_v42, %v1393_v39  ;;  %v1396_v46 = vpop.f32.mrb[2].mxu0 }
 0x165   :  { %v1417_v45 = vadd.f32 %v1416_v43, %v1415_v40  ;;  %v1418_v47 = vpop.f32.mrb[2].mxu1  ;;  %v1397_v48 = vpop.f32.mrb[3].mxu0 }
 0x166   :  { %v1419_v49 = vpop.f32.mrb[3].mxu1  ;;  %v703_v50 = vadd.f32 %v1395_v44, %v1267_v41 }
 0x168   :  { %v743_v51 = vadd.f32 %v1417_v45, %v703_v50 }
 0x182   :  { %v1437_v52 = vpop.f32.mrb[4].mxu0 }
 0x183   :  { %v1459_v53 = vpop.f32.mrb[4].mxu1  ;;  %v1438_v54 = vpop.f32.mrb[5].mxu0 }
 0x184   :  { %v1460_v55 = vpop.f32.mrb[5].mxu1  ;;  %v1439_v56 = vadd.f32 %v1438_v54, %v1437_v52  ;;  %v1440_v58 = vpop.f32.mrb[6].mxu0 }
 0x185   :  { %v1461_v57 = vadd.f32 %v1460_v55, %v1459_v53  ;;  %v1462_v59 = vpop.f32.mrb[6].mxu1  ;;  %v1441_v60 = vpop.f32.mrb[7].mxu0 }
 0x186   :  { %v1463_v61 = vpop.f32.mrb[7].mxu1  ;;  %v783_v62 = vadd.f32 %v1439_v56, %v743_v51 }
 0x188   :  { %v823_v63 = vadd.f32 %v1461_v57, %v783_v62 }
 0x18a   :  { %v828_v0 = vmax.f32 %v823_v63, 0.0 }
 0x18c   :  { %v829_v2 = vpack.c.bf16 %v828_v0, %v828_v0 }
 0x18e   :  { %1522 = vmatmul.mubr.bf16.vlgmr.msra.gmra.mrb[8].mxu0 %v829_v2 }
 0x18f   :  { %1526 = vmatpush3.bf16.msra.mxu0 %v1657_v1  ;;  %1541 = vmatprep.mubr.msk.bf16.mxu0 %vm1840_vm0, %v1839_v31 }
 0x190   :  { %1527 = vmatprep.subr.bf16.mxu0 %v1839_v31 }
 0x193   :  { %1528 = vmatpush3.bf16.msra.mxu0 %v1658_v3 }
 0x194   :  { %1529 = vmatprep.subr.bf16.mxu0 %v1839_v31 }
 0x197   :  { %1530 = vmatpush3.bf16.msra.mxu0 %v1659_v4 }
 0x198   :  { %1531 = vmatprep.subr.bf16.mxu0 %v1839_v31 }
 0x19b   :  { %1532 = vmatpush3.bf16.msra.mxu0 %v1660_v5 }
 0x19c   :  { %1533 = vmatprep.subr.bf16.mxu0 %v1839_v31 }
 0x19f   :  { %1534 = vmatpush3.bf16.msra.mxu0 %v1661_v6 }
 0x1a0   :  { %1535 = vmatprep.subr.bf16.mxu0 %v1839_v31 }
 0x1a3   :  { %v1490_v8 = vpop.f32.mrb[8].mxu1  ;;  %1536 = vmatpush3.bf16.msra.mxu0 %v1662_v7 }
 0x1a4   :  { %v1491_v10 = vpop.f32.mrb[9].mxu1  ;;  %1537 = vmatprep.subr.bf16.mxu0 %v1839_v31 }
 0x1a5   :  { %v1492_v12 = vadd.f32 %v1491_v10, %v1490_v8  ;;  %v1493_v13 = vpop.f32.mrb[10].mxu1 }
 0x1a6   :  { %v1494_v14 = vpop.f32.mrb[11].mxu1 }
 0x1a7   :  { %v1124_v15 = vadd.f32 %v1492_v12, %v1349_v9  ;;  %v1495_v16 = vadd.f32 %v1494_v14, %v1493_v13  ;;  %1538 = vmatpush3.bf16.msra.mxu0 %v1663_v11 }
 0x1a8   :  { %1539 = vmatprep.subr.bf16.mxu0 %v1839_v31 }
 0x1a9   :  { %v1127_v18 = vadd.f32 %v1495_v16, %v1349_v9  ;;  %v1130_v19 = vmax.f32 %v1124_v15, 0.0 }
 0x1ab   :  { %v1131_v20 = vmax.f32 %v1127_v18, 0.0  ;;  %1540 = vmatpush3.bf16.msra.mxu0 %v1664_v17 }
 0x1ad   :  { %v1132_v21 = vpack.c.bf16 %v1131_v20, %v1130_v19 }
 0x1af   :  { %1542 = vmatmul.mubr.bf16.vlgmr.msra.gmra.mrb[12].mxu0 %v1132_v21 }
 0x261   :  { %v935_v23 = vpop.f32.mrb[8].mxu0 }
 0x262   :  { %v936_v24 = vadd.f32 %v1340_v22, %v935_v23  ;;  %v1523_v25 = vpop.f32.mrb[9].mxu0 }
 0x263   :  { %v938_v26 = vpop.f32.mrb[10].mxu0 }
 0x264   :  { %941 = vst [vmem:[#allocation13] sm:$0xff] %v936_v24  ;;  %v1524_v27 = vpop.f32.mrb[11].mxu0 }
 0x282   :  { %v1238_v29 = vpop.f32.mrb[12].mxu0 }
 0x283   :  { %v1239_v30 = vadd.f32 %v1368_v28, %v1238_v29  ;;  %v1543_v31 = vpop.f32.mrb[13].mxu0 }
 0x284   :  { %v1241_v32 = vpop.f32.mrb[14].mxu0 }
 0x285   :  { %1245 = vst [vmem:[#allocation13 + $0x8] sm:$0xff] %v1239_v30  ;;  %v1242_v33 = vadd.f32 %v1368_v28, %v1241_v32  ;;  %v1544_v34 = vpop.f32.mrb[15].mxu0 }
 0x287   :  { %1246 = vst [vmem:[#allocation13 + $0x10] sm:$0xff] %v1242_v33 }
 0x288   :  { %1808 = shalt.err (!%p1805_p10)
}
 0x289   :  { %s1809_s1 = scalar_lea.hbm %s2041_s10, 384 }
 0x28a   :  { %p1810_p11 = scmp.ne.s32.totalorder %s2041_s10, %s1809_s1  ;;  %p1813_p12 = scmp.lt.u32.totalorder %s1809_s1, %s2041_s10 }
 0x28c   :  { %p1815_p13 = pnand %p1813_p12, %p1810_p11 }
 0x28e   :  { %1818 = shalt.err (!%p1815_p13)
}
 0x28f   :  { %1258 = dma.vmem_to_hbm [thread:$0]  %s1253_s15, 384, %s2041_s10, [#allocation4], %s1830_s23, %s1830_s23, %s1831_s24  }
 0x290   :  { %1827 = dma.done.wait [#allocation4], 384  }
 0x291   :  { %1828 = vsyncadd [#allocation4], 4294966912 }
 0x292   :  { %1262 = vsyncpa [#allocation3], 1 }
 0x293   :  { %1263 = vsyncpa [#allocation6], 1 }
 0x294   :  { %1264 = vsyncpa [#allocation9], 1 }
 0x295   :  { %1265 = vsyncpa [#allocation12], 1 }
 0x296   :  { %1266 = vsyncpa [#allocation4], 1 }

</bundles_post_ra>
